<compile_context>
chip_gen: v5e
topology: v5e:2x2
jax: 0.10.0
libtpu: 0.0.40
codegen_flags: <defaults>
</compile_context>

<pallas_src>
import functools
import math

import jax
import jax.numpy as jnp
from jax import lax
from jax.experimental import pallas as pl
from jax.experimental.pallas import tpu as pltpu


def _round_up(x, m):
    return (x + m - 1) // m * m


def _tpu_generation():
    try:
        kind = jax.devices()[0].device_kind.lower()
    except Exception:
        return None
    for tag in ("v7", "v6", "v5"):
        if tag in kind:
            return tag
    return None


_HAS_BUFFERED = hasattr(pl, "Buffered")


def _resident_spec(shape, index_map, single_buffer):
    """BlockSpec for grid-invariant (resident) operands.

    Constant index_map => the block is DMA'd once; double-buffering it only
    wastes VMEM, so ask for a single buffer when supported (big weights only).
    """
    if single_buffer and _HAS_BUFFERED:
        try:
            return pl.BlockSpec(shape, index_map, pipeline_mode=pl.Buffered(1))
        except Exception:  # older jax: no pipeline_mode kwarg
            pass
    return pl.BlockSpec(shape, index_map)


def _ffn_residual(x, w1_ref, b1_ref, w2_ref, b2_ref, out_dtype):
    """linear2(relu(linear1(x))) + x with f32 accumulation (weights are W^T)."""
    w1 = w1_ref[...]
    w2 = w2_ref[...]
    b1 = b1_ref[...].astype(jnp.float32)
    b2 = b2_ref[...].astype(jnp.float32)
    h = jnp.dot(x.astype(w1.dtype), w1, preferred_element_type=jnp.float32) + b1
    h = jnp.maximum(h, 0.0)                                         # ReLU
    ffn = jnp.dot(h.astype(w2.dtype), w2, preferred_element_type=jnp.float32) + b2
    return (ffn + x).astype(out_dtype)


def _single_tile_kernel(q_ref, k_ref, v_ref, bias_ref, w1_ref, b1_ref, w2_ref,
                        b2_ref, o_ref, *, inv_scale, mask_mode, mm_dtype):
    """Fast path: the whole K/V sequence fits in one tile -> plain softmax."""
    q = q_ref[0]                                     # (TQ, Dp) native dtype
    qs = (q * inv_scale).astype(mm_dtype)            # scale folded into Q
    k = k_ref[0].astype(mm_dtype)                    # (TK, Dp)
    v = v_ref[0].astype(mm_dtype)

    # Q @ K^T without materializing a transpose: contract the D axes.
    s = lax.dot_general(qs, k, (((1,), (1,)), ((), ())),
                        preferred_element_type=jnp.float32)        # (TQ, TK)
    if mask_mode == "bias":
        s = s + bias_ref[...]                        # 0 for valid, -1e30 pad

    m = jnp.max(s, axis=-1, keepdims=True)
    p = jnp.exp(s - m)
    l = jnp.sum(p, axis=-1, keepdims=True)
    v_att = jnp.dot(p.astype(mm_dtype), v,
                    preferred_element_type=jnp.float32) * (1.0 / l)  # exact
    x = q.astype(jnp.float32) + v_att                # residual in f32
    o_ref[0] = _ffn_residual(x, w1_ref, b1_ref, w2_ref, b2_ref, o_ref.dtype)


def _flash_kernel(q_ref, k_ref, v_ref, bias_ref, w1_ref, b1_ref, w2_ref, b2_ref,
                  o_ref, qs_sc, m_sc, l_sc, acc_sc, *,
                  inv_scale, mask_mode, lk_valid, block_k, mm_dtype):
    """Flash (online-softmax) path over multiple K tiles, fused FFN epilogue."""
    j = pl.program_id(2)

    @pl.when(j == 0)
    def _init():
        # Hoist the Q scaling out of the k loop (Q block is constant across j).
        qs_sc[...] = (q_ref[0] * inv_scale).astype(mm_dtype)
        m_sc[...] = jnp.full(m_sc.shape, -jnp.inf, jnp.float32)
        l_sc[...] = jnp.zeros(l_sc.shape, jnp.float32)
        acc_sc[...] = jnp.zeros(acc_sc.shape, jnp.float32)

    k = k_ref[0].astype(mm_dtype)                    # (TK, Dp)
    v = v_ref[0].astype(mm_dtype)
    s = lax.dot_general(qs_sc[...], k, (((1,), (1,)), ((), ())),
                        preferred_element_type=jnp.float32)        # (TQ, TK)

    if mask_mode == "bias":
        s = s + bias_ref[...]                        # one VPU add per element
    elif mask_mode == "iota":                        # fallback for odd block_k
        col = lax.broadcasted_iota(jnp.int32, s.shape, 1) + j * block_k
        s = jnp.where(col < lk_valid, s, jnp.float32(-1e30))

    # Online (flash) softmax accumulation; statistics kept in f32.
    m_prev = m_sc[...]
    m_new = jnp.maximum(m_prev, jnp.max(s, axis=-1, keepdims=True))
    alpha = jnp.exp(m_prev - m_new)
    p = jnp.exp(s - m_new)
    l_sc[...] = alpha * l_sc[...] + jnp.sum(p, axis=-1, keepdims=True)
    acc_sc[...] = alpha * acc_sc[...] + jnp.dot(
        p.astype(mm_dtype), v, preferred_element_type=jnp.float32)
    m_sc[...] = m_new

    @pl.when(j == pl.num_programs(2) - 1)
    def _finalize():
        v_att = acc_sc[...] * (1.0 / l_sc[...])      # exact normalization
        x = q_ref[0].astype(jnp.float32) + v_att
        o_ref[0] = _ffn_residual(x, w1_ref, b1_ref, w2_ref, b2_ref, o_ref.dtype)


def transformer_block(Q, K, V, params, eps=1e-08, *, block_q=None, block_k=None,
                      use_bf16_matmul=None):
    """Q: (B, Lq, D), K/V: (B, Lk, D). Returns (B, Lq, D)."""
    B, Lq, D = Q.shape
    _, Lk, _ = K.shape

    # ---- per-generation VMEM budget & tile caps -----------------------------
    gen = _tpu_generation()
    if gen == "v7":                       # 64 MiB physical VMEM per TC
        vmem_limit, tq_cap, tk_cap = 48 * 2**20, 128, 256
    elif gen in ("v5", "v6"):             # 128 MiB physical VMEM
        vmem_limit, tq_cap, tk_cap = 96 * 2**20, 256, 512
    else:                                 # unknown backend: conservative
        vmem_limit, tq_cap, tk_cap = 32 * 2**20, 128, 256

    if use_bf16_matmul is None:
        use_bf16_matmul = Q.dtype == jnp.bfloat16
    mm_dtype = jnp.bfloat16 if use_bf16_matmul else jnp.float32

    # ---- tiling (lane-dense D, sublane-aligned Lq, flash tiling on Lk) ------
    Dp = _round_up(D, 128)
    TQ = block_q if block_q is not None else (
        _round_up(Lq, 8) if Lq <= tq_cap else tq_cap)
    Lq_pad = _round_up(Lq, TQ)
    TK = block_k if block_k is not None else (Lk if Lk <= tk_cap else tk_cap)
    Lk_pad = _round_up(Lk, TK)
    nQ, nK = Lq_pad // TQ, Lk_pad // TK
    need_mask = Lk_pad != Lk
    if not need_mask:
        mask_mode = "none"
    elif TK % 128 == 0 or TK == Lk_pad:
        mask_mode = "bias"                # additive bias row, lane-legal tiles
    else:
        mask_mode = "iota"                # legal for any user-provided block_k

    # ---- operand prep -------------------------------------------------------
    # TODO(synk): for D << 128 the pad/unpad passes add HBM traffic; a no-pad
    #             (last block dim == D) variant would remove them at the cost
    #             of masked (non lane-dense) output stores.
    Qp = jnp.pad(Q, ((0, 0), (0, Lq_pad - Lq), (0, Dp - D)))
    Kp = jnp.pad(K, ((0, 0), (0, Lk_pad - Lk), (0, Dp - D)))
    Vp = jnp.pad(V, ((0, 0), (0, Lk_pad - Lk), (0, Dp - D)))

    # nn.Linear computes x @ W.T + b; pass W.T so the kernel does x @ w.
    w_dtype = jnp.bfloat16 if use_bf16_matmul else params["w1"].dtype
    w1t = jnp.pad(params["w1"].T.astype(w_dtype), ((0, Dp - D), (0, Dp - D)))
    w2t = jnp.pad(params["w2"].T.astype(w_dtype), ((0, Dp - D), (0, Dp - D)))
    b1 = jnp.pad(params["b1"].astype(jnp.float32), (0, Dp - D)).reshape(1, Dp)
    b2 = jnp.pad(params["b2"].astype(jnp.float32), (0, Dp - D)).reshape(1, Dp)

    # Key-padding bias row: 0 for valid keys, -1e30 for padded tail keys.
    bias = jnp.where(jnp.arange(Lk_pad) < Lk, 0.0, -1e30)
    bias = bias.astype(jnp.float32).reshape(1, Lk_pad)

    inv_scale = 1.0 / (math.sqrt(max(1.0, float(D))) + eps)
    single_buf_w = Dp >= 512              # single-buffer big resident weights

    if nK == 1:
        kernel = functools.partial(_single_tile_kernel, inv_scale=inv_scale,
                                   mask_mode=mask_mode, mm_dtype=mm_dtype)
        grid = (B, nQ)
        q_spec = pl.BlockSpec((1, TQ, Dp), lambda b, i: (b, i, 0))
        kv_spec = pl.BlockSpec((1, TK, Dp), lambda b, i: (b, 0, 0))
        bias_spec = pl.BlockSpec((1, Lk_pad), lambda b, i: (0, 0))
        wmap = lambda b, i: (0, 0)
        out_spec = pl.BlockSpec((1, TQ, Dp), lambda b, i: (b, i, 0))
        scratch = []
        semantics = ("parallel", "parallel")
    else:
        kernel = functools.partial(_flash_kernel, inv_scale=inv_scale,
                                   mask_mode=mask_mode, lk_valid=Lk,
                                   block_k=TK, mm_dtype=mm_dtype)
        grid = (B, nQ, nK)
        q_spec = pl.BlockSpec((1, TQ, Dp), lambda b, i, j: (b, i, 0))
        kv_spec = pl.BlockSpec((1, TK, Dp), lambda b, i, j: (b, j, 0))
        if mask_mode == "bias":
            bias_spec = pl.BlockSpec((1, TK), lambda b, i, j: (0, j))
        else:
            bias_spec = pl.BlockSpec((1, Lk_pad), lambda b, i, j: (0, 0))
        wmap = lambda b, i, j: (0, 0)
        out_spec = pl.BlockSpec((1, TQ, Dp), lambda b, i, j: (b, i, 0))
        scratch = [
            pltpu.VMEM((TQ, Dp), mm_dtype),      # pre-scaled Q (hoisted over k)
            pltpu.VMEM((TQ, 1), jnp.float32),    # running max m
            pltpu.VMEM((TQ, 1), jnp.float32),    # running denom l
            pltpu.VMEM((TQ, Dp), jnp.float32),   # output accumulator
        ]
        semantics = ("parallel", "parallel", "arbitrary")

    in_specs = [
        q_spec, kv_spec, kv_spec, bias_spec,
        _resident_spec((Dp, Dp), wmap, single_buf_w),   # W1^T (resident)
        _resident_spec((1, Dp), wmap, False),           # b1
        _resident_spec((Dp, Dp), wmap, single_buf_w),   # W2^T (resident)
        _resident_spec((1, Dp), wmap, False),           # b2
    ]

    out = pl.pallas_call(
        kernel,
        out_shape=jax.ShapeDtypeStruct((B, Lq_pad, Dp), Q.dtype),
        grid_spec=pltpu.PrefetchScalarGridSpec(
            num_scalar_prefetch=0, grid=grid, in_specs=in_specs,
            out_specs=out_spec, scratch_shapes=scratch),
        compiler_params=pltpu.CompilerParams(
            dimension_semantics=semantics, vmem_limit_bytes=vmem_limit),
    )(Qp, Kp, Vp, bias, w1t, b1, w2t, b2)

    if Lq_pad != Lq or Dp != D:
        out = out[:, :Lq, :D]
    return out


def init_params(key, input_size):
    """Parameter init mirroring the module: xavier_normal_ weights,
    default nn.Linear uniform(-1/sqrt(D), 1/sqrt(D)) biases."""
    k1, k2, k3, k4 = jax.random.split(key, 4)
    D = input_size
    xavier_std = math.sqrt(2.0 / (D + D))
    bound = 1.0 / math.sqrt(D)
    return {
        "w1": jax.random.normal(k1, (D, D), jnp.float32) * xavier_std,
        "b1": jax.random.uniform(k2, (D,), jnp.float32, -bound, bound),
        "w2": jax.random.normal(k3, (D, D), jnp.float32) * xavier_std,
        "b2": jax.random.uniform(k4, (D,), jnp.float32, -bound, bound),
    }


def _reference(Q, K, V, params, eps=1e-08):
    """Pure-JAX reference matching the PyTorch forward (is_layer_norm=False)."""
    D = Q.shape[-1]
    dk = max(1.0, float(D))
    scores = jnp.einsum("bqd,bkd->bqk", Q, K) / (math.sqrt(dk) + eps)
    probs = jax.nn.softmax(scores, axis=-1)
    v_att = jnp.einsum("bqk,bkd->bqd", probs, V)
    X = Q + v_att
    h = jnp.maximum(X @ params["w1"].T + params["b1"], 0.0)
    ffn = h @ params["w2"].T + params["b2"]
    return ffn + X


if __name__ == "__main__":
    key = jax.random.PRNGKey(0)
    kq, kk, kv_, kp = jax.random.split(key, 4)

    D = 32
    params = init_params(kp, D)

    # Tolerance note: on TPU, default-precision matmuls truncate f32 operands
    # to bf16 (single MXU pass).  Kernel and XLA reference both do this but
    # with different decompositions (flash softmax, folded scale, padded
    # contraction), so they only agree to ~bf16-epsilon level; 2e-2 sits
    # comfortably above that noise floor while still catching real bugs.
    tol = dict(atol=2e-2, rtol=2e-2)

    # Test 1: module-like small shapes -> single-K-tile fast path, no mask.
    B, Lq, Lk = 2, 8, 8
    Q = jax.random.normal(kq, (B, Lq, D), jnp.float32)
    K = jax.random.normal(kk, (B, Lk, D), jnp.float32)
    V = jax.random.normal(kv_, (B, Lk, D), jnp.float32)
    out = jax.block_until_ready(transformer_block(Q, K, V, params))
    ref = _reference(Q, K, V, params)
    assert out.shape == (B, Lq, D)
    err = float(jnp.max(jnp.abs(out - ref)))
    assert jnp.allclose(out, ref, **tol), f"test1 max err {err}"

    # Test 2: multi-tile flash path with the iota tail mask (block_k % 128 != 0).
    k2q, k2k, k2v = jax.random.split(jax.random.PRNGKey(1), 3)
    B2, Lq2, Lk2 = 1, 24, 40
    Q2 = jax.random.normal(k2q, (B2, Lq2, D), jnp.float32)
    K2 = jax.random.normal(k2k, (B2, Lk2, D), jnp.float32)
    V2 = jax.random.normal(k2v, (B2, Lk2, D), jnp.float32)
    out2 = jax.block_until_ready(
        transformer_block(Q2, K2, V2, params, block_q=8, block_k=16))
    ref2 = _reference(Q2, K2, V2, params)
    assert out2.shape == (B2, Lq2, D)
    err2 = float(jnp.max(jnp.abs(out2 - ref2)))
    assert jnp.allclose(out2, ref2, **tol), f"test2 max err {err2}"

    # Test 3: multi-tile flash path with the additive-bias tail mask (TK=128).
    k3q, k3k, k3v = jax.random.split(jax.random.PRNGKey(2), 3)
    B3, Lq3, Lk3 = 2, 16, 200
    Q3 = jax.random.normal(k3q, (B3, Lq3, D), jnp.float32)
    K3 = jax.random.normal(k3k, (B3, Lk3, D), jnp.float32)
    V3 = jax.random.normal(k3v, (B3, Lk3, D), jnp.float32)
    out3 = jax.block_until_ready(
        transformer_block(Q3, K3, V3, params, block_k=128))
    ref3 = _reference(Q3, K3, V3, params)
    assert out3.shape == (B3, Lq3, D)
    err3 = float(jnp.max(jnp.abs(out3 - ref3)))
    assert jnp.allclose(out3, ref3, **tol), f"test3 max err {err3}"

    print("KERNEL_OK")
</pallas_src>

<mosaic_0001>
module attributes {stable_mosaic.version = 11 : i64} {
  func.func @_single_tile_kernel(%arg0: i32, %arg1: i32, %arg2: memref<1x8x128xf32, #tpu.memory_space<vmem>>, %arg3: memref<1x8x128xf32, #tpu.memory_space<vmem>>, %arg4: memref<1x8x128xf32, #tpu.memory_space<vmem>>, %arg5: memref<1x8xf32, #tpu.memory_space<vmem>>, %arg6: memref<128x128xf32, #tpu.memory_space<vmem>>, %arg7: memref<1x128xf32, #tpu.memory_space<vmem>>, %arg8: memref<128x128xf32, #tpu.memory_space<vmem>>, %arg9: memref<1x128xf32, #tpu.memory_space<vmem>>, %arg10: memref<1x8x128xf32, #tpu.memory_space<vmem>>) attributes {dimension_semantics = [#tpu.dimension_semantics<parallel>, #tpu.dimension_semantics<parallel>], iteration_bounds = array<i64: 2, 1>, scalar_prefetch = 0 : i64, scratch_operands = 0 : i64, tpu.core_type = #tpu.core_type<tc>, window_params = [{transform_indices = @transform_0, window_bounds = array<i64: 1, 8, 128>}, {transform_indices = @transform_1, window_bounds = array<i64: 1, 8, 128>}, {transform_indices = @transform_2, window_bounds = array<i64: 1, 8, 128>}, {pipeline_mode = #tpu.pipeline_mode<synchronous>, transform_indices = @transform_3, window_bounds = array<i64: 1, 8>}, {pipeline_mode = #tpu.pipeline_mode<synchronous>, transform_indices = @transform_4, window_bounds = array<i64: 128, 128>}, {pipeline_mode = #tpu.pipeline_mode<synchronous>, transform_indices = @transform_5, window_bounds = array<i64: 1, 128>}, {pipeline_mode = #tpu.pipeline_mode<synchronous>, transform_indices = @transform_6, window_bounds = array<i64: 128, 128>}, {pipeline_mode = #tpu.pipeline_mode<synchronous>, transform_indices = @transform_7, window_bounds = array<i64: 1, 128>}, {transform_indices = @transform_8, window_bounds = array<i64: 1, 8, 128>}]} {
    %c0 = arith.constant 0 : index
    %c0_0 = arith.constant 0 : index
    %c0_1 = arith.constant 0 : index
    %0 = vector.load %arg2[%c0, %c0_0, %c0_1] : memref<1x8x128xf32, #tpu.memory_space<vmem>>, vector<1x8x128xf32>
    %1 = vector.shape_cast %0 : vector<1x8x128xf32> to vector<8x128xf32>
    %cst = arith.constant 0.176776692 : f32
    %2 = vector.broadcast %cst : f32 to vector<8x128xf32>
    %3 = arith.mulf %1, %2 : vector<8x128xf32>
    %c0_2 = arith.constant 0 : index
    %c0_3 = arith.constant 0 : index
    %c0_4 = arith.constant 0 : index
    %4 = vector.load %arg3[%c0_2, %c0_3, %c0_4] : memref<1x8x128xf32, #tpu.memory_space<vmem>>, vector<1x8x128xf32>
    %5 = vector.shape_cast %4 : vector<1x8x128xf32> to vector<8x128xf32>
    %c0_5 = arith.constant 0 : index
    %c0_6 = arith.constant 0 : index
    %c0_7 = arith.constant 0 : index
    %6 = vector.load %arg4[%c0_5, %c0_6, %c0_7] : memref<1x8x128xf32, #tpu.memory_space<vmem>>, vector<1x8x128xf32>
    %7 = vector.shape_cast %6 : vector<1x8x128xf32> to vector<8x128xf32>
    %cst_8 = arith.constant dense<0.000000e+00> : vector<8x8xf32>
    %8 = tpu.matmul %3, %5, %cst_8 {dimension_numbers = #tpu.dot_dimension_numbers<[1], [1], [0], [0], [0, 0, 1, 0], [], []>} : vector<8x128xf32>, vector<8x128xf32>, vector<8x8xf32> -> vector<8x8xf32>
    %cst_9 = arith.constant dense<0xFF800000> : vector<8xf32>
    %9 = vector.multi_reduction <maximumf>, %8, %cst_9 [1] : vector<8x8xf32> to vector<8xf32>
    %10 = vector.shape_cast %9 : vector<8xf32> to vector<8x1xf32>
    %11 = vector.broadcast %10 : vector<8x1xf32> to vector<8x8xf32>
    %12 = arith.subf %8, %11 : vector<8x8xf32>
    %13 = math.exp %12 : vector<8x8xf32>
    %cst_10 = arith.constant dense<0.000000e+00> : vector<8xf32>
    %14 = vector.multi_reduction <add>, %13, %cst_10 [1] : vector<8x8xf32> to vector<8xf32>
    %15 = vector.shape_cast %14 : vector<8xf32> to vector<8x1xf32>
    %cst_11 = arith.constant dense<0.000000e+00> : vector<8x128xf32>
    %16 = tpu.matmul %13, %7, %cst_11 {dimension_numbers = #tpu.dot_dimension_numbers<[1], [0], [0], [1], [0, 0, 1, 1], [], []>} : vector<8x8xf32>, vector<8x128xf32>, vector<8x128xf32> -> vector<8x128xf32>
    %cst_12 = arith.constant 1.000000e+00 : f32
    %17 = vector.broadcast %cst_12 : f32 to vector<8x1xf32>
    %18 = arith.divf %17, %15 : vector<8x1xf32>
    %19 = vector.broadcast %18 : vector<8x1xf32> to vector<8x128xf32>
    %20 = arith.mulf %16, %19 : vector<8x128xf32>
    %21 = arith.addf %1, %20 : vector<8x128xf32>
    %c0_13 = arith.constant 0 : index
    %c0_14 = arith.constant 0 : index
    %22 = vector.load %arg6[%c0_13, %c0_14] : memref<128x128xf32, #tpu.memory_space<vmem>>, vector<128x128xf32>
    %c0_15 = arith.constant 0 : index
    %c0_16 = arith.constant 0 : index
    %23 = vector.load %arg8[%c0_15, %c0_16] : memref<128x128xf32, #tpu.memory_space<vmem>>, vector<128x128xf32>
    %c0_17 = arith.constant 0 : index
    %c0_18 = arith.constant 0 : index
    %24 = vector.load %arg7[%c0_17, %c0_18] : memref<1x128xf32, #tpu.memory_space<vmem>>, vector<1x128xf32>
    %c0_19 = arith.constant 0 : index
    %c0_20 = arith.constant 0 : index
    %25 = vector.load %arg9[%c0_19, %c0_20] : memref<1x128xf32, #tpu.memory_space<vmem>>, vector<1x128xf32>
    %cst_21 = arith.constant dense<0.000000e+00> : vector<8x128xf32>
    %26 = tpu.matmul %21, %22, %cst_21 {dimension_numbers = #tpu.dot_dimension_numbers<[1], [0], [0], [1], [0, 0, 1, 1], [], []>} : vector<8x128xf32>, vector<128x128xf32>, vector<8x128xf32> -> vector<8x128xf32>
    %27 = vector.broadcast %24 : vector<1x128xf32> to vector<8x128xf32>
    %28 = arith.addf %26, %27 : vector<8x128xf32>
    %cst_22 = arith.constant 0.000000e+00 : f32
    %29 = vector.broadcast %cst_22 : f32 to vector<8x128xf32>
    %30 = arith.maximumf %28, %29 : vector<8x128xf32>
    %cst_23 = arith.constant dense<0.000000e+00> : vector<8x128xf32>
    %31 = tpu.matmul %30, %23, %cst_23 {dimension_numbers = #tpu.dot_dimension_numbers<[1], [0], [0], [1], [0, 0, 1, 1], [], []>} : vector<8x128xf32>, vector<128x128xf32>, vector<8x128xf32> -> vector<8x128xf32>
    %32 = vector.broadcast %25 : vector<1x128xf32> to vector<8x128xf32>
    %33 = arith.addf %31, %32 : vector<8x128xf32>
    %34 = arith.addf %33, %21 : vector<8x128xf32>
    %c0_24 = arith.constant 0 : index
    %c0_25 = arith.constant 0 : index
    %c0_26 = arith.constant 0 : index
    %35 = vector.load %arg10[%c0_24, %c0_25, %c0_26] : memref<1x8x128xf32, #tpu.memory_space<vmem>>, vector<1x8x128xf32>
    %36 = vector.shape_cast %35 : vector<1x8x128xf32> to vector<8x128xf32>
    %37 = vector.shape_cast %34 : vector<8x128xf32> to vector<1x8x128xf32>
    tpu.vector_store %arg10[%c0_24, %c0_25, %c0_26], %37 {strides = array<i32>} : memref<1x8x128xf32, #tpu.memory_space<vmem>>, vector<1x8x128xf32>,
    return
  }
  func.func @transform_0(%arg0: i32, %arg1: i32) -> (i32, i32, i32) {
    %c0_i32 = arith.constant 0 : i32
    %c0_i32_0 = arith.constant 0 : i32
    return %arg0, %arg1, %c0_i32 : i32, i32, i32
  }
  func.func @transform_1(%arg0: i32, %arg1: i32) -> (i32, i32, i32) {
    %c0_i32 = arith.constant 0 : i32
    %c0_i32_0 = arith.constant 0 : i32
    %c0_i32_1 = arith.constant 0 : i32
    return %arg0, %c0_i32, %c0_i32_0 : i32, i32, i32
  }
  func.func @transform_2(%arg0: i32, %arg1: i32) -> (i32, i32, i32) {
    %c0_i32 = arith.constant 0 : i32
    %c0_i32_0 = arith.constant 0 : i32
    %c0_i32_1 = arith.constant 0 : i32
    return %arg0, %c0_i32, %c0_i32_0 : i32, i32, i32
  }
  func.func @transform_3(%arg0: i32, %arg1: i32) -> (i32, i32) {
    %c0_i32 = arith.constant 0 : i32
    %c0_i32_0 = arith.constant 0 : i32
    %c0_i32_1 = arith.constant 0 : i32
    return %c0_i32, %c0_i32_0 : i32, i32
  }
  func.func @transform_4(%arg0: i32, %arg1: i32) -> (i32, i32) {
    %c0_i32 = arith.constant 0 : i32
    %c0_i32_0 = arith.constant 0 : i32
    %c0_i32_1 = arith.constant 0 : i32
    return %c0_i32, %c0_i32_0 : i32, i32
  }
  func.func @transform_5(%arg0: i32, %arg1: i32) -> (i32, i32) {
    %c0_i32 = arith.constant 0 : i32
    %c0_i32_0 = arith.constant 0 : i32
    %c0_i32_1 = arith.constant 0 : i32
    return %c0_i32, %c0_i32_0 : i32, i32
  }
  func.func @transform_6(%arg0: i32, %arg1: i32) -> (i32, i32) {
    %c0_i32 = arith.constant 0 : i32
    %c0_i32_0 = arith.constant 0 : i32
    %c0_i32_1 = arith.constant 0 : i32
    return %c0_i32, %c0_i32_0 : i32, i32
  }
  func.func @transform_7(%arg0: i32, %arg1: i32) -> (i32, i32) {
    %c0_i32 = arith.constant 0 : i32
    %c0_i32_0 = arith.constant 0 : i32
    %c0_i32_1 = arith.constant 0 : i32
    return %c0_i32, %c0_i32_0 : i32, i32
  }
  func.func @transform_8(%arg0: i32, %arg1: i32) -> (i32, i32, i32) {
    %c0_i32 = arith.constant 0 : i32
    %c0_i32_0 = arith.constant 0 : i32
    return %arg0, %arg1, %c0_i32 : i32, i32, i32
  }
}

</mosaic_0001>

<bundles_post_ra>
// kernel: tpu_custom_call.1
= control target key start
LH: loop header
LB: loop body
LE: loop exit
PB: predicated region body
PF: predicated region fallthrough
CT: control target
= control target key end

     0   :  { %s1386_s0 = inlined_call_operand.hbm [shape: f32[2,8,128], index: 0, kind: input, shape index: {}]   ;;  %s1387_s1 = inlined_call_operand.hbm [shape: f32[2,8,128], index: 1, kind: input, shape index: {}]   ;;  %s1388_s2 = inlined_call_operand.hbm [shape: f32[2,8,128], index: 2, kind: input, shape index: {}]   ;;  %s1389_s3 = inlined_call_operand.vmem [shape: f32[1,8], index: 3, kind: input, shape index: {}]   ;;  %s1390_s4 = inlined_call_operand.hbm [shape: f32[128,128], index: 4, kind: input, shape index: {}]   ;;  %s1391_s5 = inlined_call_operand.vmem [shape: f32[1,128], index: 5, kind: input, shape index: {}]   ;;  %s1392_s6 = inlined_call_operand.hbm [shape: f32[128,128], index: 6, kind: input, shape index: {}]   ;;  %s1393_s7 = inlined_call_operand.vmem [shape: f32[1,128], index: 7, kind: input, shape index: {}]   ;;  %s1394_s8 = inlined_call_operand.hbm [shape: f32[2,8,128], index: 8, kind: output, shape index: {}]  }
   0x1   :  { %1407 = sst [smem:[#allocation24_spill]] %s1387_s1 }
   0x2   :  { %1408 = sst [smem:[#allocation25_spill]] %s1390_s4 }
   0x3   :  { %1409 = sst [smem:[#allocation26_spill]] %s1392_s6 }
   0x4   :  { %1410 = sst [smem:[#allocation27_spill]] %s1394_s8 }
   0x5   :  { %13 = vsyncpa [#allocation3], 0 }
   0x6   :  { %15 = vsyncpa [#allocation3 + $0x1], 0 }
   0x7   :  { %16 = vsyncpa [#allocation6], 0 }
   0x8   :  { %18 = vsyncpa [#allocation6 + $0x1], 0 }
   0x9   :  { %19 = vsyncpa [#allocation9], 0 }
   0xa   :  { %20 = vsyncpa [#allocation4], 0 }
   0xb   :  { %22 = vsyncpa [#allocation4 + $0x1], 0  ;;  %s1180_s3 = smov 0   ;;  %s1182_s27 = smov 0  }
   0xc   :  { %s1184_s28 = smov 0   ;;  %s1186_s29 = smov 0  }
   0xd   :  { %s1188_s30 = smov 0   ;;  %s1190_s9 = smov 0  }
   0xe LB: > { %1411 = sst [smem:[#allocation16_spill]] %s1109_s3  ;;  %s1211_s10 = sadd.s32 4294967295, %s1129_s9   ;;  %s1129_s9 = sphi %s1190_s9, %s28_s9   ;;  %s1125_s30 = sphi %s1188_s30, %s1440_s30   ;;  %s1121_s29 = sphi %s1186_s29, %s1439_s29   ;;  %s1117_s28 = sphi %s1184_s28, %s1438_s28   ;;  %s1113_s27 = sphi %s1182_s27, %s1442_s27   ;;  %s1109_s3 = sphi %s1180_s3, %s1441_s3  }
   0xf   : > { %1412 = sst [smem:[#allocation17_spill]] %s1117_s28  ;;  %p766_p0 = scmp.ge.s32.totalorder %s1129_s9, 1 }
  0x10   : > { %1413 = sst [smem:[#allocation18_spill]] %s1125_s30  ;;  %p63_p1 = scmp.eq.s32.totalorder %s1211_s10, 0 }
  0x11   : > { %1414 = sst [smem:[#allocation19_spill]] %s1129_s9  ;;  %p258_p2 = scmp.lt.s32.totalorder %s1129_s9, 3 }
  0x12   : > { %s1415_s4 = sld [smem:[#allocation25_spill]]  ;;  %s1131_s15 = smov [#allocation8]  }
  0x13   : > { %p1219_p3 = pnand %p766_p0, %p258_p2  ;;  %s274_s16 = sshll.u32 %s1131_s15, 4  ;;  %s275_s16 = int_to_ptr.vmem [resolvable:$true] %s274_s16 }
  0x14   : > { %s1395_s18 = smov 128   ;;  %s1396_s19 = smov 8  }
  0x15   : > { %p804_p4 = pneg %p1219_p3  ;;  %s765_s20 = sadd.s32 4294967294, %s1129_s9  }
  0x16   : > { %s40_s21 = sadd.s32 1, %s1125_s30  ;;  %s49_s22 = sadd.s32 1, %s1117_s28 }
  0x17   : > { %p1227_p5 = pnand %p804_p4, %p63_p1  ;;  %p42_p7 = scmp.ge.s32.totalorder %s40_s21, 2 }
  0x18   : > { %s272_s13 = sshll.u32 %s1415_s4, 4  ;;  %p56_p8 = scmp.ne.s32.totalorder %s1117_s28, %s1113_s27  ;;  %s273_s13 = int_to_ptr.hbm [resolvable:$true] %s272_s13 }
  0x19   : > { %807 = dma.hbm_to_vmem [thread:$0]  (!%p1227_p5), %s273_s13, 2048, %s275_s16, [#allocation9], %s1395_s18, %s1395_s18, %s1396_s19  }
  0x1a   : > { %p57_p9 = scmp.eq.s32.totalorder %s1129_s9, 0  ;;  %p62_p10 = scmp.ne.s32.totalorder %s1113_s27, %s1109_s3 }
  0x1b   : > { %s1444_s21 = smov (%p42_p7, %s40_s21), 0  ;;  %p245_p13 = scmp.eq.s32.totalorder %s1211_s10, 1 }
  0x1c   : > { %1418 = sst [smem:[#allocation20_spill]] %s1444_s21  ;;  %p1247_p11 = por %p57_p9, %p56_p8 }
  0x1d   : > { %p1253_p12 = por %p63_p1, %p62_p10  ;;  %s44_s25 = ssub.s32 %s1125_s30, %s1444_s21 }
  0x1e   : > { %p47_p0 = scmp.eq.s32.totalorder %s44_s25, 0  ;;  %p251_p2 = scmp.eq.s32.totalorder %s765_s20, 1 }
  0x1f   : > { %p1260_p4 = por %p245_p13, %p56_p8  ;;  %p827_p7 = scmp.lt.s32.totalorder %s1129_s9, 2 }
  0x20   : > { %s1266_s11 = scalar_select %p47_p0, %s1117_s28, %s49_s22  }
  0x21   : > { %s1421_s26 = scalar_select %p1260_p4, 1, 0 }
  0x22   : > { %1423 = sst [smem:[#allocation22_spill]] %s1266_s11  ;;  %p1268_p9 = por %p251_p2, %p62_p10 }
  0x23   : > { %1422 = sst [smem:[#allocation21_spill]] %s1421_s26  ;;  %s308_s13 = sand.u32 1, %s1117_s28  }
  0x24   : > { %s1424_s12 = scalar_select %p1268_p9, 1, 0 }
  0x25   : > { %s1273_s15 = sshll.u32 %s308_s13, 3  ;;  %s771_s16 = sshll.u32 %s1125_s30, 3 }
  0x26   : > { %1425 = sst [smem:[#allocation23_spill]] %s1424_s12  ;;  %p1278_p6 = pnand %p827_p7, %p1247_p11 }
  0x27   : > { %s328_s25 = sand.u32 1, %s1129_s9   ;;  %s1427_s1 = sld [smem:[#allocation24_spill]] }
  0x28   : > { %s332_s21 = scalar_lea.vmem [#allocation5], %s1273_s15  ;;  %s329_s30 = scalar_lea.sflag [#allocation6], %s328_s25 }
  0x29   : > { %s340_s11 = sshll.u32 %s332_s21, 4  ;;  %s1428_s6 = sld [smem:[#allocation26_spill]]  ;;  %s341_s11 = int_to_ptr.vmem [resolvable:$true] %s340_s11 }
  0x2a   : > { %s1134_s9 = smov [#allocation10]   ;;  %s1429_s18 = smov 8  }
  0x2b   : > { %s291_s3 = sshll.u32 %s1134_s9, 4  ;;  %s317_s25 = scalar_lea.hbm %s1386_s0, %s771_s16  ;;  %s292_s3 = int_to_ptr.vmem [resolvable:$true] %s291_s3 }
  0x2c   : > { %s309_s28 = scalar_lea.sflag [#allocation3], %s308_s13  ;;  %s355_s17 = scalar_lea.hbm %s1388_s2, %s771_s16 }
  0x2d   : > { %s336_s19 = scalar_lea.hbm %s1427_s1, %s771_s16  ;;  %s351_s26 = scalar_lea.vmem [#allocation7], %s1273_s15 }
  0x2e   : > { %s338_s4 = sshll.u32 %s336_s19, 4  ;;  %s1430_s19 = smov 128   ;;  %s339_s4 = int_to_ptr.hbm [resolvable:$true] %s338_s4 }
  0x2f   : > { %817 = dma.hbm_to_vmem [thread:$0]  (!%p1278_p6), %s339_s4, 128, %s341_s11, %s329_s30  }
  0x30   : > { %s289_s12 = sshll.u32 %s1428_s6, 4  ;;  %s319_s4 = sshll.u32 %s317_s25, 4  ;;  %s290_s12 = int_to_ptr.hbm [resolvable:$true] %s289_s12  ;;  %s320_s4 = int_to_ptr.hbm [resolvable:$true] %s319_s4 }
  0x31   : > { %810 = dma.hbm_to_vmem [thread:$0]  (!%p1227_p5), %s290_s12, 2048, %s292_s3, [#allocation9], %s1430_s19, %s1430_s19, %s1429_s18  }
  0x32   : > { %s312_s11 = scalar_lea.vmem [#allocation2], %s1273_s15  ;;  %s357_s6 = sshll.u32 %s355_s17, 4  ;;  %s358_s6 = int_to_ptr.hbm [resolvable:$true] %s357_s6 }
  0x33   : > { %s321_s1 = sshll.u32 %s312_s11, 4  ;;  %s359_s8 = sshll.u32 %s351_s26, 4  ;;  %s322_s1 = int_to_ptr.vmem [resolvable:$true] %s321_s1  ;;  %s360_s8 = int_to_ptr.vmem [resolvable:$true] %s359_s8 }
  0x34   : > { %814 = dma.hbm_to_vmem [thread:$0]  (!%p1278_p6), %s320_s4, 128, %s322_s1, %s309_s28  }
  0x35   : > { %820 = dma.hbm_to_vmem [thread:$0]  (!%p1278_p6), %s358_s6, 128, %s360_s8, %s329_s30  }
  0x36   : > { %368 = sbr.rel (%p1219_p3) target bundleno = 736 (0x2e0), region = 52  ;;  %s1312_s3 = sand.u32 (!%p1219_p3), 1, %s1113_s27  }
  0x37   : > { %s1315_s1 = sshll.u32 (!%p1219_p3), %s1312_s3, 3  ;;  %s371_s12 = scalar_lea.sflag (!%p1219_p3), [#allocation3], %s1312_s3 }
  0x38   : > { %s374_s13 = scalar_lea.vmem (!%p1219_p3), [#allocation2], %s1315_s1 }
  0x3b   : > { %1092 = dma.done.wait (%p1253_p12), %s371_s12, 128  }
  0x3c   : > { %1094 = vsyncadd (%p1253_p12), %s371_s12, 4294967168  ;;  %s380_s6 = sand.u32 1, %s1211_s10   ;;  %s384_s30 = scalar_lea.vmem [#allocation5], %s1315_s1 }
  0x3d   : > { %s381_s8 = scalar_lea.sflag [#allocation6], %s380_s6 }
  0x3e   : > { %1096 = dma.done.wait (%p1253_p12), %s381_s8, 256  }
  0x3f   : > { %1098 = vsyncadd (%p1253_p12), %s381_s8, 4294967040  ;;  %s394_s14 = scalar_lea.vmem [#allocation7], %s1315_s1 }
  0x40   : > { %1100 = dma.done.wait (%p63_p1), [#allocation9], 4096  }
  0x41   : > { %1102 = vsyncadd (%p63_p1), [#allocation9], 4294963200  ;;  %v450_v0 = vld [vmem:[%s384_s30] sm:$0xff]  ;;  %v1334_v1 = vld [vmem:[%s374_s13] sm:$0xff]  ;;  %vm472_vm0 = vcmask 64512   ;;  %s785_s26 = sshll.u32 %s1121_s29, 3 }
  0x42   : > { %467 = vmatpush.xpose.msra.mxu0 %v450_v0  ;;  %v449_v2 = vmul.f32 0.17677669, %v1334_v1  ;;  %v451_v5 = vld [vmem:[%s394_s14] sm:$0xff]  ;;  %v535_v8 = vld [vmem:[#allocation8 + $0x68] sm:$0xff]  ;;  %v534_v9 = vld [vmem:[#allocation8 + $0x60] sm:$0xff]  ;;  %s1431_s19 = sld [smem:[#allocation27_spill]] }
  0x43   : > { %500 = vmatpush.msra.mxu1 %v451_v5  ;;  %v537_v6 = vld [vmem:[#allocation8 + $0x78] sm:$0xff]  ;;  %v536_v7 = vld [vmem:[#allocation8 + $0x70] sm:$0xff]  ;;  %v531_v17 = vld [vmem:[#allocation8 + $0x48] sm:$0xff]  ;;  %s447_s25 = scalar_lea.vmem [#allocation11], %s1315_s1  ;;  %s606_s28 = scalar_lea.sflag [#allocation4], %s1312_s3 }
  0x44   : > { %559 = vmatpush.msra.mxu2 %v537_v6  ;;  %v533_v10 = vld [vmem:[#allocation8 + $0x58] sm:$0xff]  ;;  %v532_v16 = vld [vmem:[#allocation8 + $0x50] sm:$0xff]  ;;  %v530_v18 = vld [vmem:[#allocation8 + $0x40] sm:$0xff]  ;;  %s619_s4 = sshll.u32 %s447_s25, 4  ;;  %s620_s4 = int_to_ptr.vmem [resolvable:$true] %s619_s4 }
  0x45   : > { %468 = vmatmul.f32.vlgmr.msra.gmra.mxu0 %v449_v2  ;;  %v529_v19 = vld [vmem:[#allocation8 + $0x38] sm:$0xff]  ;;  %v528_v20 = vld [vmem:[#allocation8 + $0x30] sm:$0xff]  ;;  %v527_v21 = vld [vmem:[#allocation8 + $0x28] sm:$0xff] }
  0x46   : > { %560 = vmatpush.msra.mxu2 %v536_v7  ;;  %v526_v22 = vld [vmem:[#allocation8 + $0x20] sm:$0xff]  ;;  %v525_v23 = vld [vmem:[#allocation8 + $0x18] sm:$0xff]  ;;  %v524_v24 = vld [vmem:[#allocation8 + $0x10] sm:$0xff] }
  0x47   : > { %v523_v25 = vld [vmem:[#allocation8 + $0x8] sm:$0xff]  ;;  %v522_v26 = vld [vmem:[#allocation8] sm:$0xff]  ;;  %v553_v27 = vld [vmem:[#allocation10 + $0x78] sm:$0xff] }
  0x48   : > { %561 = vmatpush.msra.mxu2 %v535_v8  ;;  %v552_v28 = vld [vmem:[#allocation10 + $0x70] sm:$0xff]  ;;  %583 = vmatpush.msra.mxu3 %v553_v27  ;;  %v551_v29 = vld [vmem:[#allocation10 + $0x68] sm:$0xff]  ;;  %v550_v30 = vld [vmem:[#allocation10 + $0x60] sm:$0xff]  ;;  %s617_s22 = scalar_lea.hbm %s1431_s19, %s785_s26  ;;  %s1059_s12 = scalar_lea.hbm %s1431_s19, 16 }
  0x49   : > { %v549_v31 = vld [vmem:[#allocation10 + $0x58] sm:$0xff]  ;;  %v548_v32 = vld [vmem:[#allocation10 + $0x50] sm:$0xff]  ;;  %v547_v34 = vld [vmem:[#allocation10 + $0x48] sm:$0xff]  ;;  %s621_s11 = sshll.u32 %s617_s22, 4  ;;  %s622_s11 = int_to_ptr.hbm [resolvable:$true] %s621_s11 }
  0x4a   : > { %562 = vmatpush.msra.mxu2 %v534_v9  ;;  %584 = vmatpush.msra.mxu3 %v552_v28  ;;  %v546_v35 = vld [vmem:[#allocation10 + $0x40] sm:$0xff]  ;;  %v545_v36 = vld [vmem:[#allocation10 + $0x38] sm:$0xff]  ;;  %v544_v37 = vld [vmem:[#allocation10 + $0x30] sm:$0xff]  ;;  %s1053_s29 = sshra.s32 %s622_s11, 4  ;;  %s1054_s29 = int_to_ptr.hbm [resolvable:$true] %s1053_s29 }
  0x4b   : > { %v543_v40 = vld [vmem:[#allocation10 + $0x28] sm:$0xff]  ;;  %v542_v42 = vld [vmem:[#allocation10 + $0x20] sm:$0xff]  ;;  %v541_v46 = vld [vmem:[#allocation10 + $0x18] sm:$0xff]  ;;  %s1055_s9 = scalar_lea.hbm %s1054_s29, 8  ;;  %p1060_p6 = scmp.lt.s32.totalorder %s1054_s29, %s1431_s19 }
  0x4c   : > { %563 = vmatpush.msra.mxu2 %v533_v10  ;;  %585 = vmatpush.msra.mxu3 %v551_v29  ;;  %v540_v54 = vld [vmem:[#allocation10 + $0x10] sm:$0xff]  ;;  %v539_v55 = vld [vmem:[#allocation10 + $0x8] sm:$0xff]  ;;  %v538_v56 = vld [vmem:[#allocation10] sm:$0xff]  ;;  %p1056_p1 = scmp.ne.s32.totalorder %s1054_s29, %s1055_s9  ;;  %p1061_p8 = scmp.lt.s32.totalorder %s1059_s12, %s1055_s9 }
  0x4d   : > { %v883_v57 = vld [vmem:[%s1391_s5] ss:$0 sm:$0xff] }
  0x4e   : > { %564 = vmatpush.msra.mxu2 %v532_v16  ;;  %586 = vmatpush.msra.mxu3 %v550_v30  ;;  %v884_v61 = vld [vmem:[%s1393_s7] ss:$0 sm:$0xff]  ;;  %p1057_p3 = pnand %p1056_p1, %p1260_p4  ;;  %p1062_p10 = por %p1061_p8, %p1060_p6 }
  0x50   : > { %565 = vmatpush.msra.mxu2 %v531_v17  ;;  %587 = vmatpush.msra.mxu3 %v549_v31  ;;  %p1058_p5 = pneg %p1057_p3 }
  0x52   : > { %566 = vmatpush.msra.mxu2 %v530_v18  ;;  %588 = vmatpush.msra.mxu3 %v548_v32  ;;  %p1063_p11 = pnand %p1062_p10, %p1058_p5 }
  0x54   : > { %567 = vmatpush.msra.mxu2 %v529_v19  ;;  %589 = vmatpush.msra.mxu3 %v547_v34 }
  0x56   : > { %568 = vmatpush.msra.mxu2 %v528_v20  ;;  %590 = vmatpush.msra.mxu3 %v546_v35 }
  0x58   : > { %569 = vmatpush.msra.mxu2 %v527_v21  ;;  %591 = vmatpush.msra.mxu3 %v545_v36 }
  0x5a   : > { %570 = vmatpush.msra.mxu2 %v526_v22  ;;  %592 = vmatpush.msra.mxu3 %v544_v37 }
  0x5c   : > { %571 = vmatpush.msra.mxu2 %v525_v23  ;;  %593 = vmatpush.msra.mxu3 %v543_v40 }
  0x5e   : > { %572 = vmatpush.msra.mxu2 %v524_v24  ;;  %594 = vmatpush.msra.mxu3 %v542_v42 }
  0x60   : > { %573 = vmatpush.msra.mxu2 %v523_v25  ;;  %595 = vmatpush.msra.mxu3 %v541_v46 }
  0x62   : > { %574 = vmatpush.msra.mxu2 %v522_v26  ;;  %596 = vmatpush.msra.mxu3 %v540_v54 }
  0x64   : > { %597 = vmatpush.msra.mxu3 %v539_v55 }
  0x66   : > { %598 = vmatpush.msra.mxu3 %v538_v56 }
  0xc2   : > { %v469_v3 = vpop.f32.mrf.mxu0 }
  0xc3   : > { %v473_v4 = vsel %vm472_vm0, %v469_v3, -inf }
  0xc4   : > { %474 = vmax.xlane.f32.xlu0 %v473_v4 }
 0x137   : > { %v475_v11 = vpop.xlane.xlu0 %474 }
 0x138   : > { %v476_v12 = vsub.f32 %v469_v3, %v475_v11 }
 0x13a   : > { %v477_v13 = vmul.f32 1.442695, %v476_v12 }
 0x13c   : > { %885 = vpow2.f32 %v477_v13 }
 0x142   : > { %v886_v14 = vpop.eup %885 }
 0x143   : > { %783 = vmatmul.msk.f32.vlgmr.msra.gmra.mxu1 %vm472_vm0, %v886_v14  ;;  %v479_v15 = vsel %vm472_vm0, %v886_v14, 0.0 }
 0x144   : > { %480 = vadd.xlane.f32.xlu0 %v479_v15 }
 0x1b7   : > { %v481_v33 = vpop.xlane.xlu0 %480 }
 0x1b8   : > { %887 = vrcp.f32 %v481_v33  ;;  %v516_v43 = vand.u32 2147483648, %v481_v33  ;;  %v514_v45 = vand.u32 2147483647, %v481_v33  ;;  %vm510_vm2 = vweird.f32 %v481_v33 }
 0x1ba   : > { %v517_v48 = vor.u32 1.1754944e-38, %v516_v43  ;;  %vm515_vm4 = vcmp.eq.f32.partialorder %v514_v45, 8.507059e+37 }
 0x1be   : > { %v888_v38 = vpop.eup %887 }
 0x1bf   : > { %v506_v39 = vmul.f32 %v888_v38, %v481_v33  ;;  %vm511_vm1 = vweird.f32 %v888_v38 }
 0x1c0   : > { %vm512_vm3 = vmor %vm510_vm2, %vm511_vm1  ;;  %v502_v50 = vpop.f32.mrf.mxu1 }
 0x1c1   : > { %v507_v41 = vsub.f32 1.0, %v506_v39 }
 0x1c3   : > { %v508_v44 = vmul.f32 %v888_v38, %v507_v41 }
 0x1c5   : > { %v509_v47 = vadd.f32 %v888_v38, %v508_v44 }
 0x1c7   : > { %v513_v49 = vsel %vm512_vm3, %v888_v38, %v509_v47 }
 0x1c8   : > { %v518_v51 = vsel %vm515_vm4, %v517_v48, %v513_v49 }
 0x1c9   : > { %v520_v52 = vmul.f32 %v518_v51, %v502_v50 }
 0x1cb   : > { %v521_v53 = vadd.f32 %v520_v52, %v1334_v1 }
 0x1cd   : > { %575 = vmatmul.f32.vlgmr.msra.gmra.mxu2 %v521_v53 }
 0x250   : > { %v576_v58 = vpop.f32.mrf.mxu2 }
 0x251   : > { %v577_v59 = vadd.f32 %v883_v57, %v576_v58 }
 0x253   : > { %v579_v60 = vmax.f32 %v577_v59, 0.0 }
 0x255   : > { %599 = vmatmul.f32.vlgmr.msra.gmra.mxu3 %v579_v60 }
 0x2d8   : > { %v600_v62 = vpop.f32.mrf.mxu3 }
 0x2d9   : > { %v601_v63 = vadd.f32 %v884_v61, %v600_v62 }
 0x2db   : > { %v603_v0 = vadd.f32 %v601_v63, %v521_v53 }
 0x2dd   : > { %604 = vst [vmem:[%s447_s25] sm:$0xff] %v603_v0 }
 0x2de   : > { %1066 = shalt.err (!%p1063_p11)
}
 0x2df   : > { %802 = dma.vmem_to_hbm [thread:$0]  (%p1260_p4), %s620_s4, 128, %s622_s11, %s606_s28  }
 0x2e0 PF: > { %s1433_s3 = sld [smem:[#allocation16_spill]] }
 0x2e1   : > { %s1435_s8 = sld [smem:[#allocation19_spill]] }
 0x2e6   : > { %s633_s30 = sand.u32 1, %s1433_s3  }
 0x2e7   : > { %p1436_p12 = scmp.ge.s32.totalorder %s1435_s8, 2  ;;  %s634_s14 = scalar_lea.sflag [#allocation4], %s633_s30 }
 0x2e9   : > { %p822_p13 = pnand %p1436_p12, %p1268_p9 }
 0x2eb   : > { %p823_p0 = pneg %p822_p13 }
 0x2ed   : > { %1104 = dma.done.wait (%p823_p0), %s634_s14, 128  }
 0x2ee   : > { %1106 = vsyncadd (%p823_p0), %s634_s14, 4294967168  ;;  %s28_s9 = sadd.s32 1, %s1435_s8   ;;  %s1437_s10 = sld [smem:[#allocation17_spill]] }
 0x2ef   : > { %p25_p2 = scmp.ge.s32.totalorder %s28_s9, 4   ;;  %s1438_s28 = sld [smem:[#allocation22_spill]] }
 0x2f0   : > { %s1439_s29 = sld [smem:[#allocation18_spill]]  ;;  %s1441_s3 = smov %s1113_s27 }
 0x2f1   : > { %s1440_s30 = sld [smem:[#allocation20_spill]]  ;;  %27 = sbr.rel (!%p25_p2) target bundleno = 14 (0xe), region = 129 }
 0x2f4   : > { %s1442_s27 = smov %s1437_s10 }
 0x2f6   :  { %640 = vsyncpa [#allocation3], 1 }
 0x2f7   :  { %642 = vsyncpa [#allocation3 + $0x1], 1 }
 0x2f8   :  { %643 = vsyncpa [#allocation6], 1 }
 0x2f9   :  { %645 = vsyncpa [#allocation6 + $0x1], 1 }
 0x2fa   :  { %646 = vsyncpa [#allocation9], 1 }
 0x2fb   :  { %647 = vsyncpa [#allocation4], 1 }
 0x2fc   :  { %649 = vsyncpa [#allocation4 + $0x1], 1 }

</bundles_post_ra>
